<compile_context>
chip_gen: v5e
topology: v5e:2x2
jax: 0.10.0
libtpu: 0.0.40
codegen_flags: <defaults>
</compile_context>

<pallas_src>
import jax
import jax.numpy as jnp
from jax.experimental import pallas as pl
from jax.experimental.pallas import tpu as pltpu

BN_EPS = 1e-5
_VMEM_LIMIT = 32 * 1024 * 1024  # safe on v5e/v6e/v7x; tiles below are tiny


def _stats_kernel(x_ref, w_ref, sum_ref, sumsq_ref):
    # x_ref:   (Cin, TL)   one L-tile of one batch element (NCL, L on lanes)
    # w_ref:   (Cout, Cin) conv1x1 weight
    # sum_ref, sumsq_ref: (Cout, 1) accumulators, resident across the whole grid
    @pl.when((pl.program_id(0) == 0) & (pl.program_id(1) == 0))
    def _():
        sum_ref[...] = jnp.zeros_like(sum_ref)
        sumsq_ref[...] = jnp.zeros_like(sumsq_ref)

    y = jnp.dot(w_ref[...], x_ref[...], preferred_element_type=jnp.float32)  # (Cout, TL)
    sum_ref[...] += jnp.sum(y, axis=1, keepdims=True)
    sumsq_ref[...] += jnp.sum(y * y, axis=1, keepdims=True)


def _apply_kernel(x_ref, w_ref, scale_ref, shift_ref, o_ref):
    # Fused 1x1 conv + BN affine + ReLU; output stays in NCL layout.
    y = jnp.dot(w_ref[...], x_ref[...], preferred_element_type=jnp.float32)  # (Cout, TL)
    o_ref[...] = jnp.maximum(y * scale_ref[...] + shift_ref[...], 0.0).astype(o_ref.dtype)


def _pick_lane_tile(L):
    # Lane-dense tiles (multiples of 128) when possible; otherwise the full dimension,
    # which is exempt from the (8,128) divisibility rule.
    if L % 128 == 0:
        for cand in (512, 256, 128):
            if L % cand == 0:
                return cand
    return L


def branch_0_forward(x_ncl, conv_w, bn_gamma, bn_beta):
    """x_ncl: (N, Cin, L); conv_w: (Cout, Cin, 1); bn_gamma/bn_beta: (Cout,)."""
    N, Cin, L = x_ncl.shape
    Cout = conv_w.shape[0]
    M = N * L
    TL = _pick_lane_tile(L)
    grid = (N, L // TL)

    x_ncl = x_ncl.astype(jnp.float32)
    w2 = conv_w[:, :, 0].astype(jnp.float32)  # (Cout, Cin)

    x_spec = pl.BlockSpec((pl.Squeezed(), Cin, TL), lambda n, l: (n, 0, l))
    w_spec = pl.BlockSpec((Cout, Cin), lambda n, l: (0, 0))
    col_spec = pl.BlockSpec((Cout, 1), lambda n, l: (0, 0))

    # ---- Pass 1: per-channel sum / sum-of-squares of the conv output -------------------
    sum_y, sumsq_y = pl.pallas_call(
        _stats_kernel,
        out_shape=(jax.ShapeDtypeStruct((Cout, 1), jnp.float32),
                   jax.ShapeDtypeStruct((Cout, 1), jnp.float32)),
        grid=grid,
        in_specs=[x_spec, w_spec],
        out_specs=(col_spec, col_spec),
        compiler_params=pltpu.CompilerParams(
            dimension_semantics=("arbitrary", "arbitrary"),  # sequential accumulation
            vmem_limit_bytes=_VMEM_LIMIT),
        cost_estimate=pl.CostEstimate(
            flops=2 * M * Cin * Cout + 3 * M * Cout,
            transcendentals=0,
            bytes_accessed=4 * (M * Cin + Cin * Cout + 2 * Cout)),
    )(x_ncl, w2)

    # ---- Tiny glue: fold BN (training-mode batch stats) into one affine ----------------
    count = jnp.float32(M)
    mean = sum_y / count
    var = jnp.maximum(sumsq_y / count - mean * mean, 0.0)  # biased variance, clamped
    scale = bn_gamma.astype(jnp.float32).reshape(Cout, 1) * jax.lax.rsqrt(var + BN_EPS)
    shift = bn_beta.astype(jnp.float32).reshape(Cout, 1) - mean * scale
    # TODO(synk): running_mean/running_var updates (and eval-mode BN) are not produced;
    # this matches the default PyTorch forward in training mode only.

    # ---- Pass 2: fused conv1x1 + BN affine + ReLU, tiled, pipelined, NCL output --------
    out = pl.pallas_call(
        _apply_kernel,
        out_shape=jax.ShapeDtypeStruct((N, Cout, L), jnp.float32),
        grid=grid,
        in_specs=[x_spec, w_spec, col_spec, col_spec],
        out_specs=pl.BlockSpec((pl.Squeezed(), Cout, TL), lambda n, l: (n, 0, l)),
        compiler_params=pltpu.CompilerParams(
            dimension_semantics=("parallel", "parallel"),  # megacore-shardable
            vmem_limit_bytes=_VMEM_LIMIT),
        cost_estimate=pl.CostEstimate(
            flops=2 * M * Cin * Cout + 3 * M * Cout,
            transcendentals=0,
            bytes_accessed=4 * (M * Cin + M * Cout + Cin * Cout + 2 * Cout)),
    )(x_ncl, w2, scale, shift)

    return out


def _reference(x_ncl, conv_w, bn_gamma, bn_beta):
    # Pure-JAX reference of the PyTorch forward (train-mode BN).
    y = jnp.einsum('oc,ncl->nol', conv_w[:, :, 0], x_ncl)          # (N, Cout, L)
    mean = jnp.mean(y, axis=(0, 2), keepdims=True)
    var = jnp.mean((y - mean) ** 2, axis=(0, 2), keepdims=True)
    y_hat = (y - mean) * jax.lax.rsqrt(var + BN_EPS)
    y_bn = y_hat * bn_gamma.reshape(1, -1, 1) + bn_beta.reshape(1, -1, 1)
    return jnp.maximum(y_bn, 0.0)


if __name__ == "__main__":
    # Small shapes implied by the module: Conv1d over (N, Cin, L).
    N, Cin, Cout, L = 2, 4, 8, 16

    key = jax.random.PRNGKey(0)
    kx, kw, kg, kb = jax.random.split(key, 4)

    x = jax.random.normal(kx, (N, Cin, L), dtype=jnp.float32)
    conv_w = jax.random.normal(kw, (Cout, Cin, 1), dtype=jnp.float32) * (1.0 / (Cin ** 0.5))
    bn_gamma = 1.0 + 0.1 * jax.random.normal(kg, (Cout,), dtype=jnp.float32)
    bn_beta = 0.1 * jax.random.normal(kb, (Cout,), dtype=jnp.float32)

    out = branch_0_forward(x, conv_w, bn_gamma, bn_beta)
    jax.block_until_ready(out)

    assert out.shape == (N, Cout, L), out.shape
    ref = _reference(x, conv_w, bn_gamma, bn_beta)
    assert jnp.allclose(out, ref, atol=1e-3, rtol=1e-3), float(jnp.max(jnp.abs(out - ref)))
    print("KERNEL_OK")
</pallas_src>

<mosaic_0001>
module attributes {stable_mosaic.version = 11 : i64} {
  func.func @_stats_kernel(%arg0: i32, %arg1: i32, %arg2: memref<1x4x16xf32, #tpu.memory_space<vmem>>, %arg3: memref<8x4xf32, #tpu.memory_space<vmem>>, %arg4: memref<8x1xf32, #tpu.memory_space<vmem>>, %arg5: memref<8x1xf32, #tpu.memory_space<vmem>>) attributes {dimension_semantics = [#tpu.dimension_semantics<arbitrary>, #tpu.dimension_semantics<arbitrary>], iteration_bounds = array<i64: 2, 1>, scalar_prefetch = 0 : i64, scratch_operands = 0 : i64, tpu.core_type = #tpu.core_type<tc>, window_params = [{transform_indices = @transform_0, window_bounds = array<i64: 1, 4, 16>}, {pipeline_mode = #tpu.pipeline_mode<synchronous>, transform_indices = @transform_1, window_bounds = array<i64: 8, 4>}, {pipeline_mode = #tpu.pipeline_mode<synchronous>, transform_indices = @transform_2, window_bounds = array<i64: 8, 1>}, {pipeline_mode = #tpu.pipeline_mode<synchronous>, transform_indices = @transform_3, window_bounds = array<i64: 8, 1>}]} {
    %c0_i32 = arith.constant 0 : i32
    %0 = arith.cmpi eq, %arg0, %c0_i32 : i32
    %c0_i32_0 = arith.constant 0 : i32
    %1 = arith.cmpi eq, %arg1, %c0_i32_0 : i32
    %2 = arith.andi %0, %1 : i1
    %3 = arith.extui %2 : i1 to i32
    %c0_i32_1 = arith.constant 0 : i32
    %4 = arith.cmpi ne, %3, %c0_i32_1 : i32
    scf.if %4 {
      %cst_16 = arith.constant 0.000000e+00 : f32
      %20 = vector.broadcast %cst_16 : f32 to vector<8x1xf32>
      %c0_17 = arith.constant 0 : index
      %c0_18 = arith.constant 0 : index
      %21 = vector.load %arg4[%c0_17, %c0_18] : memref<8x1xf32, #tpu.memory_space<vmem>>, vector<8x1xf32>
      tpu.vector_store %arg4[%c0_17, %c0_18], %20 {strides = array<i32>} : memref<8x1xf32, #tpu.memory_space<vmem>>, vector<8x1xf32>,
      %cst_19 = arith.constant 0.000000e+00 : f32
      %22 = vector.broadcast %cst_19 : f32 to vector<8x1xf32>
      %c0_20 = arith.constant 0 : index
      %c0_21 = arith.constant 0 : index
      %23 = vector.load %arg5[%c0_20, %c0_21] : memref<8x1xf32, #tpu.memory_space<vmem>>, vector<8x1xf32>
      tpu.vector_store %arg5[%c0_20, %c0_21], %22 {strides = array<i32>} : memref<8x1xf32, #tpu.memory_space<vmem>>, vector<8x1xf32>,
    } else {
    }
    %c0 = arith.constant 0 : index
    %c0_2 = arith.constant 0 : index
    %5 = vector.load %arg3[%c0, %c0_2] : memref<8x4xf32, #tpu.memory_space<vmem>>, vector<8x4xf32>
    %c0_3 = arith.constant 0 : index
    %c0_4 = arith.constant 0 : index
    %c0_5 = arith.constant 0 : index
    %6 = vector.load %arg2[%c0_3, %c0_4, %c0_5] : memref<1x4x16xf32, #tpu.memory_space<vmem>>, vector<1x4x16xf32>
    %7 = vector.shape_cast %6 : vector<1x4x16xf32> to vector<4x16xf32>
    %cst = arith.constant dense<0.000000e+00> : vector<8x16xf32>
    %8 = tpu.matmul %5, %7, %cst {dimension_numbers = #tpu.dot_dimension_numbers<[1], [0], [0], [1], [0, 0, 1, 1], [], []>} : vector<8x4xf32>, vector<4x16xf32>, vector<8x16xf32> -> vector<8x16xf32>
    %c0_6 = arith.constant 0 : index
    %c0_7 = arith.constant 0 : index
    %9 = vector.load %arg4[%c0_6, %c0_7] : memref<8x1xf32, #tpu.memory_space<vmem>>, vector<8x1xf32>
    %cst_8 = arith.constant dense<0.000000e+00> : vector<8xf32>
    %10 = vector.multi_reduction <add>, %8, %cst_8 [1] : vector<8x16xf32> to vector<8xf32>
    %11 = vector.shape_cast %10 : vector<8xf32> to vector<8x1xf32>
    %12 = arith.addf %9, %11 : vector<8x1xf32>
    %c0_9 = arith.constant 0 : index
    %c0_10 = arith.constant 0 : index
    %13 = vector.load %arg4[%c0_9, %c0_10] : memref<8x1xf32, #tpu.memory_space<vmem>>, vector<8x1xf32>
    tpu.vector_store %arg4[%c0_9, %c0_10], %12 {strides = array<i32>} : memref<8x1xf32, #tpu.memory_space<vmem>>, vector<8x1xf32>,
    %c0_11 = arith.constant 0 : index
    %c0_12 = arith.constant 0 : index
    %14 = vector.load %arg5[%c0_11, %c0_12] : memref<8x1xf32, #tpu.memory_space<vmem>>, vector<8x1xf32>
    %15 = arith.mulf %8, %8 : vector<8x16xf32>
    %cst_13 = arith.constant dense<0.000000e+00> : vector<8xf32>
    %16 = vector.multi_reduction <add>, %15, %cst_13 [1] : vector<8x16xf32> to vector<8xf32>
    %17 = vector.shape_cast %16 : vector<8xf32> to vector<8x1xf32>
    %18 = arith.addf %14, %17 : vector<8x1xf32>
    %c0_14 = arith.constant 0 : index
    %c0_15 = arith.constant 0 : index
    %19 = vector.load %arg5[%c0_14, %c0_15] : memref<8x1xf32, #tpu.memory_space<vmem>>, vector<8x1xf32>
    tpu.vector_store %arg5[%c0_14, %c0_15], %18 {strides = array<i32>} : memref<8x1xf32, #tpu.memory_space<vmem>>, vector<8x1xf32>,
    return
  }
  func.func @transform_0(%arg0: i32, %arg1: i32) -> (i32, i32, i32) {
    %c0_i32 = arith.constant 0 : i32
    %c0_i32_0 = arith.constant 0 : i32
    return %arg0, %c0_i32, %arg1 : i32, i32, i32
  }
  func.func @transform_1(%arg0: i32, %arg1: i32) -> (i32, i32) {
    %c0_i32 = arith.constant 0 : i32
    %c0_i32_0 = arith.constant 0 : i32
    %c0_i32_1 = arith.constant 0 : i32
    return %c0_i32, %c0_i32_0 : i32, i32
  }
  func.func @transform_2(%arg0: i32, %arg1: i32) -> (i32, i32) {
    %c0_i32 = arith.constant 0 : i32
    %c0_i32_0 = arith.constant 0 : i32
    %c0_i32_1 = arith.constant 0 : i32
    return %c0_i32, %c0_i32_0 : i32, i32
  }
  func.func @transform_3(%arg0: i32, %arg1: i32) -> (i32, i32) {
    %c0_i32 = arith.constant 0 : i32
    %c0_i32_0 = arith.constant 0 : i32
    %c0_i32_1 = arith.constant 0 : i32
    return %c0_i32, %c0_i32_0 : i32, i32
  }
}

</mosaic_0001>

<bundles_post_ra>
// kernel: tpu_custom_call.1
= control target key start
LH: loop header
LB: loop body
LE: loop exit
PB: predicated region body
PF: predicated region fallthrough
CT: control target
= control target key end

     0   :  { %s354_s12 = smov 0   ;;  %s356_s13 = smov 0   ;;  %s405_s0 = inlined_call_operand.vmem [shape: f32[2,4,16], index: 0, kind: input, shape index: {}]   ;;  %s406_s1 = inlined_call_operand.vmem [shape: f32[8,4], index: 1, kind: input, shape index: {}]   ;;  %s407_s2 = inlined_call_operand.vmem [shape: f32[8,1], index: 2, kind: output, shape index: {0}]   ;;  %s408_s3 = inlined_call_operand.vmem [shape: f32[8,1], index: 3, kind: output, shape index: {1}]  }
   0x1   :  { %s358_s14 = smov 0  }
   0x2 LB: > { %s26_s15 = sadd.s32 1, %s327_s13  ;;  %p276_p0 = scmp.ge.s32.totalorder %s331_s14, 1  ;;  %s331_s14 = sphi %s358_s14, %s14_s14   ;;  %s327_s13 = sphi %s356_s13, %s410_s13   ;;  %s323_s12 = sphi %s354_s12, %s409_s12  }
   0x3   : > { %p28_p1 = scmp.ge.s32.totalorder %s26_s15, 2  ;;  %p146_p2 = scmp.lt.s32.totalorder %s331_s14, 3 }
   0x5   : > { %s412_s15 = smov (%p28_p1, %s26_s15), 0  ;;  %p147_p3 = pnand %p276_p0, %p146_p2 }
   0x6   : > { %p167_p4 = scmp.lt.s32.totalorder (!%p147_p3), %s323_s12, 1  ;;  %p174_p5 = scmp.eq.s32.totalorder (!%p147_p3), %s323_s12, 0 }
   0x7   : > { %150 = sbr.rel (%p147_p3) target bundleno = 273 (0x111), region = 28 }
   0xc   : > { %s414_s12 = smov (!%p167_p4, %s323_s12), 1  ;;  %179 = sbr.rel (!%p174_p5) target bundleno = 17 (0x11), region = 32  ;;  %vm180_vm0 = vcmask (%p174_p5), 7168   ;;  %v333_v0 = vmov (%p174_p5), 0.0  }
   0xd   : > { %s277_s16 = sshll.u32 %s414_s12, 2  ;;  %181 = vst.msk [vmem:[%s407_s2] sm:$0xff] (%p174_p5), %vm180_vm0, %v333_v0 }
   0xe   : > { %s173_s19 = scalar_lea.vmem %s405_s0, %s277_s16  ;;  %182 = vst.msk [vmem:[%s408_s3] sm:$0xff] (%p174_p5), %vm180_vm0, %v333_v0 }
  0x11 PF: > { %v184_v1 = vld [vmem:[%s173_s19] sm:$0xf]  ;;  %vm189_vm1 = vcmask 1043456   ;;  %vm185_vm2 = vcmask 31744   ;;  %vm214_vm3 = vcmask 130048   ;;  %vm219_vm4 = vcmask 7168  }
  0x12   : > { %v183_v2 = vld [vmem:[%s406_s1] sm:$0xff]  ;;  %279 = vmatpush.msk.msra.mxu0 %vm189_vm1, %v184_v1 }
  0x13   : > { %280 = vmatmul.msk.f32.vlgmr.msra.gmra.mxu0 %vm185_vm2, %v183_v2 }
  0x14   : > { %v213_v7 = vld [vmem:[%s407_s2] sm:$0xff] }
  0x15   : > { %v221_v10 = vld [vmem:[%s408_s3] sm:$0xff] }
  0x90   : > { %v210_v3 = vpop.f32.mrf.mxu0 }
  0x91   : > { %v215_v4 = vsel %vm214_vm3, %v210_v3, 0.0  ;;  %v222_v5 = vmul.f32 %v210_v3, %v210_v3 }
  0x92   : > { %216 = vadd.xlane.f32.xlu0 %v215_v4 }
  0x93   : > { %v223_v6 = vsel %vm214_vm3, %v222_v5, 0.0 }
  0x9a   : > { %224 = vadd.xlane.f32.xlu0 %v223_v6 }
 0x105   : > { %v217_v8 = vpop.xlane.xlu0 %216 }
 0x106   : > { %v218_v9 = vadd.f32 %v217_v8, %v213_v7 }
 0x108   : > { %220 = vst.msk [vmem:[%s407_s2] sm:$0xff] %vm219_vm4, %v218_v9 }
 0x10d   : > { %v225_v11 = vpop.xlane.xlu0 %224 }
 0x10e   : > { %v226_v12 = vadd.f32 %v225_v11, %v221_v10 }
 0x110   : > { %227 = vst.msk [vmem:[%s408_s3] sm:$0xff] %vm219_vm4, %v226_v12 }
 0x111 PF: > { %s14_s14 = sadd.s32 1, %s331_s14   ;;  %s409_s12 = smov %s327_s13 }
 0x112   : > { %p11_p6 = scmp.ge.s32.totalorder %s14_s14, 4   ;;  %s410_s13 = smov %s412_s15 }
 0x114   :  { %13 = sbr.rel (!%p11_p6) target bundleno = 2 (0x2), region = 66 }

</bundles_post_ra>
